<compile_context>
chip_gen: v5e
topology: v5e:2x2
jax: 0.10.0
libtpu: 0.0.40
codegen_flags: <defaults>
</compile_context>

<pallas_src>
import functools

import jax
import jax.numpy as jnp
from jax import lax
from jax.experimental import pallas as pl
from jax.experimental.pallas import tpu as pltpu

DATASET_MEAN = (0.485, 0.456, 0.406)
DATASET_STD = (0.229, 0.224, 0.225)
LANE = 128


# --------------------------------------------------------------------------- #
# get_color_parameters: tiny MLP (nz -> 64 -> 32 -> 4) in plain JAX.
# Far below one MXU tile; a dedicated pallas_call would be pure launch overhead.
# --------------------------------------------------------------------------- #
def get_color_parameters(noise, params):
    w1, b1, w2, b2, w3, b3 = params
    h = jax.nn.relu(noise @ w1 + b1)
    # TODO(synk): nn.Dropout(0.2) treated as identity (eval-mode semantics).
    h = jax.nn.relu(h @ w2 + b2)
    return jnp.tanh(h @ w3 + b3)


# --------------------------------------------------------------------------- #
# Color kernel: one image per grid step.
#   order_ref  : SMEM (4,)    int32  -- runtime-random transform order
#   params_ref : SMEM (B*4,)  f32    -- flattened per-image color parameters
#   x_ref      : VMEM (3, R, 128) x.dtype -- normalized image, channel planes
#   o_ref      : VMEM (3, R, 128) x.dtype
# --------------------------------------------------------------------------- #
def _color_kernel(order_ref, params_ref, x_ref, o_ref, *, hw_true):
    b = pl.program_id(0)
    inv_hw = 1.0 / float(hw_true)

    # Load native dtype -> f32 compute (v5e has no bf16 VPU/EUP).
    # De-normalize with Python-float compile-time constants.
    r0 = x_ref[0].astype(jnp.float32) * DATASET_STD[0] + DATASET_MEAN[0]
    g0 = x_ref[1].astype(jnp.float32) * DATASET_STD[1] + DATASET_MEAN[1]
    b0 = x_ref[2].astype(jnp.float32) * DATASET_STD[2] + DATASET_MEAN[2]

    base = 4 * b
    f_bri = 1.0 + params_ref[base + 0]
    f_con = 1.0 + params_ref[base + 1]
    f_sat = 1.0 + params_ref[base + 2]
    f_hue = params_ref[base + 3] * 0.5

    def _clip(v):
        return jnp.clip(v, 0.0, 1.0)

    def _brightness(rgb):
        rr, gg, bb = rgb
        return (_clip(rr * f_bri), _clip(gg * f_bri), _clip(bb * f_bri))

    def _contrast(rgb):
        rr, gg, bb = rgb
        # Per-channel XLU reductions combined with scalar gray coefficients.
        # Padded pixels de-normalize to 0 and contribute 0; divide by true HW.
        m = (0.2989 * jnp.sum(rr) + 0.587 * jnp.sum(gg) + 0.114 * jnp.sum(bb)) * inv_hw
        return tuple(_clip(f_con * c + (1.0 - f_con) * m) for c in rgb)

    def _saturation(rgb):
        rr, gg, bb = rgb
        gray = 0.2989 * rr + 0.587 * gg + 0.114 * bb
        return tuple(_clip(f_sat * c + (1.0 - f_sat) * gray) for c in rgb)

    def _hue(rgb):
        rr, gg, bb = rgb
        maxc = jnp.maximum(jnp.maximum(rr, gg), bb)
        minc = jnp.minimum(jnp.minimum(rr, gg), bb)
        v = maxc
        cr = maxc - minc
        eqc = cr == 0.0
        ones = jnp.ones_like(maxc)
        # Guarded approximate reciprocals: EUP slot instead of VPU divides.
        inv_max = pl.reciprocal(jnp.where(eqc, ones, maxc), approx=True)
        inv_cr = pl.reciprocal(jnp.where(eqc, ones, cr), approx=True)
        s = cr * inv_max
        rc = (maxc - rr) * inv_cr
        gc = (maxc - gg) * inv_cr
        bc = (maxc - bb) * inv_cr
        is_r = maxc == rr
        is_g = (maxc == gg) & ~is_r
        hr = jnp.where(is_r, bc - gc, 0.0)
        hg = jnp.where(is_g, 2.0 + rc - bc, 0.0)
        hb = jnp.where(~is_g & ~is_r, 4.0 + gc - rc, 0.0)
        h = (hr + hg + hb) / 6.0 + 1.0
        h = h - jnp.floor(h)              # mod 1.0
        h = h + f_hue
        h = h - jnp.floor(h)              # mod 1.0 (handles negative shifts)
        # HSV -> RGB
        h6 = h * 6.0
        hi_f = jnp.floor(h6)              # bin in {0,...,5}
        fr = h6 - hi_f
        p = _clip(v * (1.0 - s))
        q = _clip(v * (1.0 - s * fr))
        t = _clip(v * (1.0 - s * (1.0 - fr)))
        # Masks computed once (float compares, no int cast), reused by all 3 channels.
        masks = (hi_f == 0.0, hi_f == 1.0, hi_f == 2.0, hi_f == 3.0, hi_f == 4.0)

        def sel(vals):
            out = vals[5]
            for k in range(4, -1, -1):
                out = jnp.where(masks[k], vals[k], out)
            return out

        return (sel((v, q, p, p, t, v)),
                sel((t, v, v, q, p, p)),
                sel((p, p, t, v, v, q)))

    def _apply_selected(o, rgb):
        # Nested lax.cond on the SMEM scalar: only the selected transform runs.
        return lax.cond(
            o < 2,
            lambda op: lax.cond(o == 0, _brightness, _contrast, op),
            lambda op: lax.cond(o == 2, _saturation, _hue, op),
            rgb,
        )

    # Rolled loop: one copy of each transform body (4 bodies, not 16).
    def _step(i, rgb):
        return _apply_selected(order_ref[i], rgb)

    r1, g1, b1 = lax.fori_loop(0, 4, _step, (r0, g0, b0))

    # Re-normalize with compile-time reciprocals of std; store in native dtype.
    o_ref[0] = ((r1 - DATASET_MEAN[0]) * (1.0 / DATASET_STD[0])).astype(o_ref.dtype)
    o_ref[1] = ((g1 - DATASET_MEAN[1]) * (1.0 / DATASET_STD[1])).astype(o_ref.dtype)
    o_ref[2] = ((b1 - DATASET_MEAN[2]) * (1.0 / DATASET_STD[2])).astype(o_ref.dtype)


def apply_color_transforms(x, colorparams, transform_order):
    B, C, H, W = x.shape
    assert C == 3, "color module operates on RGB images"
    HW = H * W
    hw_pad = ((HW + LANE - 1) // LANE) * LANE
    R = hw_pad // LANE
    dtype = x.dtype

    # Contiguous reshape only (no astype, no copy when HW % 128 == 0).
    x_flat = x.reshape(B, C, HW)
    if hw_pad != HW:
        # Pad with -mean/std so padded pixels de-normalize to exactly 0:
        # brightness/saturation/hue keep them at 0 and they contribute 0 to the
        # contrast gray-sum (which divides by the true pixel count).
        pad_vals = jnp.asarray(
            [-m / s for m, s in zip(DATASET_MEAN, DATASET_STD)], dtype
        ).reshape(1, C, 1)
        pad = jnp.broadcast_to(pad_vals, (B, C, hw_pad - HW))
        x_flat = jnp.concatenate([x_flat, pad], axis=-1)
    x_tiled = x_flat.reshape(B, C, R, LANE)   # channel planes: sublane/lane dense

    # Flat 1-D SMEM params (avoids (B,4) -> ceil(B/8)*8 x 128 SMEM padding).
    params_flat = colorparams.reshape(B * 4).astype(jnp.float32)

    # Generation-aware VMEM sizing:
    #   in+out double-buffered blocks + ~20 live (R,128) f32 hue temporaries + slack.
    itemsize = jnp.dtype(dtype).itemsize
    block_bytes = C * R * LANE * itemsize
    vmem_needed = 4 * block_bytes + 20 * R * LANE * 4 + (2 << 20)
    ckw = dict(dimension_semantics=("parallel",))
    if vmem_needed > (16 << 20):  # v5e default scoped VMEM is 16 MiB
        # Cap at 48 MiB: v7x only has 64 MiB physical VMEM.
        # TODO(synk): for very large images tile the HW axis (second "parallel"
        # grid dim, two-pass contrast mean) instead of raising the scoped limit;
        # that would also feed both v7x TensorCores when B is 1 or odd.
        ckw["vmem_limit_bytes"] = int(min(vmem_needed, 48 << 20))

    kernel = functools.partial(_color_kernel, hw_true=HW)

    out = pl.pallas_call(
        kernel,
        out_shape=jax.ShapeDtypeStruct((B, C, R, LANE), dtype),
        grid_spec=pltpu.PrefetchScalarGridSpec(
            num_scalar_prefetch=0,
            grid=(B,),
            in_specs=[
                pl.BlockSpec(memory_space=pltpu.MemorySpace.SMEM),  # order (4,)
                pl.BlockSpec(memory_space=pltpu.MemorySpace.SMEM),  # params (B*4,)
                pl.BlockSpec((None, C, R, LANE), lambda b: (b, 0, 0, 0)),
            ],
            out_specs=pl.BlockSpec((None, C, R, LANE), lambda b: (b, 0, 0, 0)),
        ),
        compiler_params=pltpu.CompilerParams(**ckw),
    )(transform_order, params_flat, x_tiled)

    if hw_pad != HW:
        out = out.reshape(B, C, hw_pad)[:, :, :HW]
    return out.reshape(B, C, H, W)


# --------------------------------------------------------------------------- #
# Module wrapper
# --------------------------------------------------------------------------- #
def init_params(key, nz):
    def linear(k, fan_in, fan_out):
        kw, kb = jax.random.split(k)
        bound = 1.0 / float(fan_in) ** 0.5
        w = jax.random.uniform(kw, (fan_in, fan_out), jnp.float32, -bound, bound)
        b = jax.random.uniform(kb, (1, fan_out), jnp.float32, -bound, bound)
        return w, b

    k1, k2, k3 = jax.random.split(key, 3)
    w1, b1 = linear(k1, nz, 64)
    w2, b2 = linear(k2, 64, 32)
    w3, b3 = linear(k3, 32, 4)
    return (w1, b1, w2, b2, w3, b3)


def color_forward(x, params, key):
    """Forward pass of the `color` module.  Returns (x_transformed, colorparams)."""
    nz = params[0].shape[0]
    B = x.shape[0]
    knoise, kperm = jax.random.split(key)
    # noise ~ Uniform(-1, 1)  (rsample)
    noise = jax.random.uniform(knoise, (B, nz), jnp.float32, minval=-1.0, maxval=1.0)
    colorparams = get_color_parameters(noise, params).astype(jnp.float32)
    # transform_order = randperm(4)
    transform_order = jax.random.permutation(kperm, 4).astype(jnp.int32)
    x_out = apply_color_transforms(x, colorparams, transform_order)
    return x_out, colorparams


if __name__ == "__main__":
    key = jax.random.PRNGKey(0)
    kx, kparams, kfwd = jax.random.split(key, 3)

    B, C, H, W = 2, 3, 16, 16
    nz = 8

    x = jax.random.normal(kx, (B, C, H, W), jnp.float32)
    params = init_params(kparams, nz)

    x_out, transformations = color_forward(x, params, kfwd)
    jax.block_until_ready(x_out)
    jax.block_until_ready(transformations)

    assert x_out.shape == (B, C, H, W)
    assert x_out.dtype == x.dtype
    assert transformations.shape == (B, 4)
    print("KERNEL_OK")
</pallas_src>

<mosaic_0001>
module attributes {stable_mosaic.version = 11 : i64} {
  func.func @_color_kernel(%arg0: i32, %arg1: memref<4xi32, #tpu.memory_space<smem>>, %arg2: memref<8xf32, #tpu.memory_space<smem>>, %arg3: memref<1x3x2x128xf32, #tpu.memory_space<vmem>>, %arg4: memref<1x3x2x128xf32, #tpu.memory_space<vmem>>) attributes {dimension_semantics = [#tpu.dimension_semantics<parallel>], iteration_bounds = array<i64: 2>, scalar_prefetch = 0 : i64, scratch_operands = 0 : i64, tpu.core_type = #tpu.core_type<tc>, window_params = [{transform_indices = @transform_0, window_bounds = array<i64: 4>}, {transform_indices = @transform_1, window_bounds = array<i64: 8>}, {transform_indices = @transform_2, window_bounds = array<i64: 1, 3, 2, 128>}, {transform_indices = @transform_3, window_bounds = array<i64: 1, 3, 2, 128>}]} {
    %c0 = arith.constant 0 : index
    %c0_0 = arith.constant 0 : index
    %c0_1 = arith.constant 0 : index
    %c0_2 = arith.constant 0 : index
    %0 = vector.load %arg3[%c0, %c0_0, %c0_1, %c0_2] : memref<1x3x2x128xf32, #tpu.memory_space<vmem>>, vector<1x1x2x128xf32>
    %1 = vector.shape_cast %0 : vector<1x1x2x128xf32> to vector<2x128xf32>
    %cst = arith.constant 2.290000e-01 : f32
    %2 = vector.broadcast %cst : f32 to vector<2x128xf32>
    %3 = arith.mulf %1, %2 : vector<2x128xf32>
    %cst_3 = arith.constant 4.850000e-01 : f32
    %4 = vector.broadcast %cst_3 : f32 to vector<2x128xf32>
    %5 = arith.addf %3, %4 : vector<2x128xf32>
    %c0_4 = arith.constant 0 : index
    %c1 = arith.constant 1 : index
    %c0_5 = arith.constant 0 : index
    %c0_6 = arith.constant 0 : index
    %6 = vector.load %arg3[%c0_4, %c1, %c0_5, %c0_6] : memref<1x3x2x128xf32, #tpu.memory_space<vmem>>, vector<1x1x2x128xf32>
    %7 = vector.shape_cast %6 : vector<1x1x2x128xf32> to vector<2x128xf32>
    %cst_7 = arith.constant 2.240000e-01 : f32
    %8 = vector.broadcast %cst_7 : f32 to vector<2x128xf32>
    %9 = arith.mulf %7, %8 : vector<2x128xf32>
    %cst_8 = arith.constant 4.560000e-01 : f32
    %10 = vector.broadcast %cst_8 : f32 to vector<2x128xf32>
    %11 = arith.addf %9, %10 : vector<2x128xf32>
    %c0_9 = arith.constant 0 : index
    %c2 = arith.constant 2 : index
    %c0_10 = arith.constant 0 : index
    %c0_11 = arith.constant 0 : index
    %12 = vector.load %arg3[%c0_9, %c2, %c0_10, %c0_11] : memref<1x3x2x128xf32, #tpu.memory_space<vmem>>, vector<1x1x2x128xf32>
    %13 = vector.shape_cast %12 : vector<1x1x2x128xf32> to vector<2x128xf32>
    %cst_12 = arith.constant 2.250000e-01 : f32
    %14 = vector.broadcast %cst_12 : f32 to vector<2x128xf32>
    %15 = arith.mulf %13, %14 : vector<2x128xf32>
    %cst_13 = arith.constant 4.060000e-01 : f32
    %16 = vector.broadcast %cst_13 : f32 to vector<2x128xf32>
    %17 = arith.addf %15, %16 : vector<2x128xf32>
    %c4_i32 = arith.constant 4 : i32
    %18 = arith.muli %c4_i32, %arg0 : i32
    %c0_i32 = arith.constant 0 : i32
    %19 = arith.addi %18, %c0_i32 : i32
    %20 = arith.index_cast %19 : i32 to index
    %21 = memref.load %arg2[%20] : memref<8xf32, #tpu.memory_space<smem>>
    %cst_14 = arith.constant 1.000000e+00 : f32
    %22 = arith.addf %cst_14, %21 : f32
    %c1_i32 = arith.constant 1 : i32
    %23 = arith.addi %18, %c1_i32 : i32
    %24 = arith.index_cast %23 : i32 to index
    %25 = memref.load %arg2[%24] : memref<8xf32, #tpu.memory_space<smem>>
    %cst_15 = arith.constant 1.000000e+00 : f32
    %26 = arith.addf %cst_15, %25 : f32
    %c2_i32 = arith.constant 2 : i32
    %27 = arith.addi %18, %c2_i32 : i32
    %28 = arith.index_cast %27 : i32 to index
    %29 = memref.load %arg2[%28] : memref<8xf32, #tpu.memory_space<smem>>
    %cst_16 = arith.constant 1.000000e+00 : f32
    %30 = arith.addf %cst_16, %29 : f32
    %c3_i32 = arith.constant 3 : i32
    %31 = arith.addi %18, %c3_i32 : i32
    %32 = arith.index_cast %31 : i32 to index
    %33 = memref.load %arg2[%32] : memref<8xf32, #tpu.memory_space<smem>>
    %cst_17 = arith.constant 5.000000e-01 : f32
    %34 = arith.mulf %33, %cst_17 : f32
    %c0_i32_18 = arith.constant 0 : i32
    %c4_i32_19 = arith.constant 4 : i32
    %35 = arith.addi %c0_i32_18, %c4_i32_19 : i32
    %c1_i32_20 = arith.constant 1 : i32
    %36:3 = scf.for %arg5 = %c0_i32_18 to %35 step %c1_i32_20 iter_args(%arg6 = %5, %arg7 = %11, %arg8 = %17) -> (vector<2x128xf32>, vector<2x128xf32>, vector<2x128xf32>)  : i32 {
      %58 = arith.index_cast %arg5 : i32 to index
      %59 = memref.load %arg1[%58] : memref<4xi32, #tpu.memory_space<smem>>
      %c2_i32_40 = arith.constant 2 : i32
      %60 = arith.cmpi slt, %59, %c2_i32_40 : i32
      %61 = arith.extui %60 : i1 to i32
      %c0_i32_41 = arith.constant 0 : i32
      %62 = arith.cmpi ne, %61, %c0_i32_41 : i32
      %63:3 = scf.if %62 -> (vector<2x128xf32>, vector<2x128xf32>, vector<2x128xf32>) {
        %c0_i32_42 = arith.constant 0 : i32
        %64 = arith.cmpi eq, %59, %c0_i32_42 : i32
        %65 = arith.extui %64 : i1 to i32
        %c0_i32_43 = arith.constant 0 : i32
        %66 = arith.cmpi ne, %65, %c0_i32_43 : i32
        %67:3 = scf.if %66 -> (vector<2x128xf32>, vector<2x128xf32>, vector<2x128xf32>) {
          %68 = vector.broadcast %22 : f32 to vector<2x128xf32>
          %69 = arith.mulf %arg6, %68 : vector<2x128xf32>
          %cst_44 = arith.constant 0.000000e+00 : f32
          %cst_45 = arith.constant 1.000000e+00 : f32
          %70 = vector.broadcast %cst_44 : f32 to vector<2x128xf32>
          %71 = arith.maximumf %70, %69 : vector<2x128xf32>
          %72 = vector.broadcast %cst_45 : f32 to vector<2x128xf32>
          %73 = arith.minimumf %72, %71 : vector<2x128xf32>
          %74 = vector.broadcast %22 : f32 to vector<2x128xf32>
          %75 = arith.mulf %arg7, %74 : vector<2x128xf32>
          %cst_46 = arith.constant 0.000000e+00 : f32
          %cst_47 = arith.constant 1.000000e+00 : f32
          %76 = vector.broadcast %cst_46 : f32 to vector<2x128xf32>
          %77 = arith.maximumf %76, %75 : vector<2x128xf32>
          %78 = vector.broadcast %cst_47 : f32 to vector<2x128xf32>
          %79 = arith.minimumf %78, %77 : vector<2x128xf32>
          %80 = vector.broadcast %22 : f32 to vector<2x128xf32>
          %81 = arith.mulf %arg8, %80 : vector<2x128xf32>
          %cst_48 = arith.constant 0.000000e+00 : f32
          %cst_49 = arith.constant 1.000000e+00 : f32
          %82 = vector.broadcast %cst_48 : f32 to vector<2x128xf32>
          %83 = arith.maximumf %82, %81 : vector<2x128xf32>
          %84 = vector.broadcast %cst_49 : f32 to vector<2x128xf32>
          %85 = arith.minimumf %84, %83 : vector<2x128xf32>
          scf.yield %73, %79, %85 : vector<2x128xf32>, vector<2x128xf32>, vector<2x128xf32>
        } else {
          %68 = vector.shape_cast %arg6 : vector<2x128xf32> to vector<1x2x128xf32>
          %cst_44 = arith.constant dense<0.000000e+00> : vector<1xf32>
          %69 = vector.multi_reduction <add>, %68, %cst_44 [1, 2] : vector<1x2x128xf32> to vector<1xf32>
          %70 = vector.shape_cast %69 : vector<1xf32> to vector<1x1x1xf32>
          %71 = vector.extract %70[0, 0, 0] : f32 from vector<1x1x1xf32>
          %cst_45 = arith.constant 2.989000e-01 : f32
          %72 = arith.mulf %cst_45, %71 : f32
          %73 = vector.shape_cast %arg7 : vector<2x128xf32> to vector<1x2x128xf32>
          %cst_46 = arith.constant dense<0.000000e+00> : vector<1xf32>
          %74 = vector.multi_reduction <add>, %73, %cst_46 [1, 2] : vector<1x2x128xf32> to vector<1xf32>
          %75 = vector.shape_cast %74 : vector<1xf32> to vector<1x1x1xf32>
          %76 = vector.extract %75[0, 0, 0] : f32 from vector<1x1x1xf32>
          %cst_47 = arith.constant 5.870000e-01 : f32
          %77 = arith.mulf %cst_47, %76 : f32
          %78 = arith.addf %72, %77 : f32
          %79 = vector.shape_cast %arg8 : vector<2x128xf32> to vector<1x2x128xf32>
          %cst_48 = arith.constant dense<0.000000e+00> : vector<1xf32>
          %80 = vector.multi_reduction <add>, %79, %cst_48 [1, 2] : vector<1x2x128xf32> to vector<1xf32>
          %81 = vector.shape_cast %80 : vector<1xf32> to vector<1x1x1xf32>
          %82 = vector.extract %81[0, 0, 0] : f32 from vector<1x1x1xf32>
          %cst_49 = arith.constant 1.140000e-01 : f32
          %83 = arith.mulf %cst_49, %82 : f32
          %84 = arith.addf %78, %83 : f32
          %cst_50 = arith.constant 3.906250e-03 : f32
          %85 = arith.mulf %84, %cst_50 : f32
          %86 = vector.broadcast %26 : f32 to vector<2x128xf32>
          %87 = arith.mulf %86, %arg6 : vector<2x128xf32>
          %cst_51 = arith.constant 1.000000e+00 : f32
          %88 = arith.subf %cst_51, %26 : f32
          %89 = arith.mulf %88, %85 : f32
          %90 = vector.broadcast %89 : f32 to vector<2x128xf32>
          %91 = arith.addf %87, %90 : vector<2x128xf32>
          %cst_52 = arith.constant 0.000000e+00 : f32
          %cst_53 = arith.constant 1.000000e+00 : f32
          %92 = vector.broadcast %cst_52 : f32 to vector<2x128xf32>
          %93 = arith.maximumf %92, %91 : vector<2x128xf32>
          %94 = vector.broadcast %cst_53 : f32 to vector<2x128xf32>
          %95 = arith.minimumf %94, %93 : vector<2x128xf32>
          %96 = vector.broadcast %26 : f32 to vector<2x128xf32>
          %97 = arith.mulf %96, %arg7 : vector<2x128xf32>
          %cst_54 = arith.constant 1.000000e+00 : f32
          %98 = arith.subf %cst_54, %26 : f32
          %99 = arith.mulf %98, %85 : f32
          %100 = vector.broadcast %99 : f32 to vector<2x128xf32>
          %101 = arith.addf %97, %100 : vector<2x128xf32>
          %cst_55 = arith.constant 0.000000e+00 : f32
          %cst_56 = arith.constant 1.000000e+00 : f32
          %102 = vector.broadcast %cst_55 : f32 to vector<2x128xf32>
          %103 = arith.maximumf %102, %101 : vector<2x128xf32>
          %104 = vector.broadcast %cst_56 : f32 to vector<2x128xf32>
          %105 = arith.minimumf %104, %103 : vector<2x128xf32>
          %106 = vector.broadcast %26 : f32 to vector<2x128xf32>
          %107 = arith.mulf %106, %arg8 : vector<2x128xf32>
          %cst_57 = arith.constant 1.000000e+00 : f32
          %108 = arith.subf %cst_57, %26 : f32
          %109 = arith.mulf %108, %85 : f32
          %110 = vector.broadcast %109 : f32 to vector<2x128xf32>
          %111 = arith.addf %107, %110 : vector<2x128xf32>
          %cst_58 = arith.constant 0.000000e+00 : f32
          %cst_59 = arith.constant 1.000000e+00 : f32
          %112 = vector.broadcast %cst_58 : f32 to vector<2x128xf32>
          %113 = arith.maximumf %112, %111 : vector<2x128xf32>
          %114 = vector.broadcast %cst_59 : f32 to vector<2x128xf32>
          %115 = arith.minimumf %114, %113 : vector<2x128xf32>
          scf.yield %95, %105, %115 : vector<2x128xf32>, vector<2x128xf32>, vector<2x128xf32>
        }
        scf.yield %67#0, %67#1, %67#2 : vector<2x128xf32>, vector<2x128xf32>, vector<2x128xf32>
      } else {
        %c2_i32_42 = arith.constant 2 : i32
        %64 = arith.cmpi eq, %59, %c2_i32_42 : i32
        %65 = arith.extui %64 : i1 to i32
        %c0_i32_43 = arith.constant 0 : i32
        %66 = arith.cmpi ne, %65, %c0_i32_43 : i32
        %67:3 = scf.if %66 -> (vector<2x128xf32>, vector<2x128xf32>, vector<2x128xf32>) {
          %cst_44 = arith.constant 2.989000e-01 : f32
          %68 = vector.broadcast %cst_44 : f32 to vector<2x128xf32>
          %69 = arith.mulf %68, %arg6 : vector<2x128xf32>
          %cst_45 = arith.constant 5.870000e-01 : f32
          %70 = vector.broadcast %cst_45 : f32 to vector<2x128xf32>
          %71 = arith.mulf %70, %arg7 : vector<2x128xf32>
          %72 = arith.addf %69, %71 : vector<2x128xf32>
          %cst_46 = arith.constant 1.140000e-01 : f32
          %73 = vector.broadcast %cst_46 : f32 to vector<2x128xf32>
          %74 = arith.mulf %73, %arg8 : vector<2x128xf32>
          %75 = arith.addf %72, %74 : vector<2x128xf32>
          %76 = vector.broadcast %30 : f32 to vector<2x128xf32>
          %77 = arith.mulf %76, %arg6 : vector<2x128xf32>
          %cst_47 = arith.constant 1.000000e+00 : f32
          %78 = arith.subf %cst_47, %30 : f32
          %79 = vector.broadcast %78 : f32 to vector<2x128xf32>
          %80 = arith.mulf %79, %75 : vector<2x128xf32>
          %81 = arith.addf %77, %80 : vector<2x128xf32>
          %cst_48 = arith.constant 0.000000e+00 : f32
          %cst_49 = arith.constant 1.000000e+00 : f32
          %82 = vector.broadcast %cst_48 : f32 to vector<2x128xf32>
          %83 = arith.maximumf %82, %81 : vector<2x128xf32>
          %84 = vector.broadcast %cst_49 : f32 to vector<2x128xf32>
          %85 = arith.minimumf %84, %83 : vector<2x128xf32>
          %86 = vector.broadcast %30 : f32 to vector<2x128xf32>
          %87 = arith.mulf %86, %arg7 : vector<2x128xf32>
          %cst_50 = arith.constant 1.000000e+00 : f32
          %88 = arith.subf %cst_50, %30 : f32
          %89 = vector.broadcast %88 : f32 to vector<2x128xf32>
          %90 = arith.mulf %89, %75 : vector<2x128xf32>
          %91 = arith.addf %87, %90 : vector<2x128xf32>
          %cst_51 = arith.constant 0.000000e+00 : f32
          %cst_52 = arith.constant 1.000000e+00 : f32
          %92 = vector.broadcast %cst_51 : f32 to vector<2x128xf32>
          %93 = arith.maximumf %92, %91 : vector<2x128xf32>
          %94 = vector.broadcast %cst_52 : f32 to vector<2x128xf32>
          %95 = arith.minimumf %94, %93 : vector<2x128xf32>
          %96 = vector.broadcast %30 : f32 to vector<2x128xf32>
          %97 = arith.mulf %96, %arg8 : vector<2x128xf32>
          %cst_53 = arith.constant 1.000000e+00 : f32
          %98 = arith.subf %cst_53, %30 : f32
          %99 = vector.broadcast %98 : f32 to vector<2x128xf32>
          %100 = arith.mulf %99, %75 : vector<2x128xf32>
          %101 = arith.addf %97, %100 : vector<2x128xf32>
          %cst_54 = arith.constant 0.000000e+00 : f32
          %cst_55 = arith.constant 1.000000e+00 : f32
          %102 = vector.broadcast %cst_54 : f32 to vector<2x128xf32>
          %103 = arith.maximumf %102, %101 : vector<2x128xf32>
          %104 = vector.broadcast %cst_55 : f32 to vector<2x128xf32>
          %105 = arith.minimumf %104, %103 : vector<2x128xf32>
          scf.yield %85, %95, %105 : vector<2x128xf32>, vector<2x128xf32>, vector<2x128xf32>
        } else {
          %68 = arith.maximumf %arg6, %arg7 : vector<2x128xf32>
          %69 = arith.maximumf %68, %arg8 : vector<2x128xf32>
          %70 = arith.minimumf %arg6, %arg7 : vector<2x128xf32>
          %71 = arith.minimumf %70, %arg8 : vector<2x128xf32>
          %72 = arith.subf %69, %71 : vector<2x128xf32>
          %cst_44 = arith.constant 0.000000e+00 : f32
          %73 = vector.broadcast %cst_44 : f32 to vector<2x128xf32>
          %74 = arith.cmpf oeq, %72, %73 : vector<2x128xf32>
          %cst_45 = arith.constant 1.000000e+00 : f32
          %75 = vector.broadcast %cst_45 : f32 to vector<2x128xf32>
          %76 = arith.select %74, %75, %69 : vector<2x128xi1>, vector<2x128xf32>
          %77 = tpu.reciprocal %76 {approx = true} : vector<2x128xf32> -> vector<2x128xf32>
          %78 = arith.select %74, %75, %72 : vector<2x128xi1>, vector<2x128xf32>
          %79 = tpu.reciprocal %78 {approx = true} : vector<2x128xf32> -> vector<2x128xf32>
          %80 = arith.mulf %72, %77 : vector<2x128xf32>
          %81 = arith.subf %69, %arg6 : vector<2x128xf32>
          %82 = arith.mulf %81, %79 : vector<2x128xf32>
          %83 = arith.subf %69, %arg7 : vector<2x128xf32>
          %84 = arith.mulf %83, %79 : vector<2x128xf32>
          %85 = arith.subf %69, %arg8 : vector<2x128xf32>
          %86 = arith.mulf %85, %79 : vector<2x128xf32>
          %87 = arith.cmpf oeq, %69, %arg6 : vector<2x128xf32>
          %88 = arith.cmpf oeq, %69, %arg7 : vector<2x128xf32>
          %cst_46 = arith.constant dense<true> : vector<2x128xi1>
          %89 = arith.xori %87, %cst_46 : vector<2x128xi1>
          %90 = arith.andi %88, %89 : vector<2x128xi1>
          %91 = arith.subf %86, %84 : vector<2x128xf32>
          %cst_47 = arith.constant 0.000000e+00 : f32
          %92 = vector.broadcast %cst_47 : f32 to vector<2x128xf32>
          %93 = arith.select %87, %91, %92 : vector<2x128xi1>, vector<2x128xf32>
          %cst_48 = arith.constant 2.000000e+00 : f32
          %94 = vector.broadcast %cst_48 : f32 to vector<2x128xf32>
          %95 = arith.addf %94, %82 : vector<2x128xf32>
          %96 = arith.subf %95, %86 : vector<2x128xf32>
          %cst_49 = arith.constant 0.000000e+00 : f32
          %97 = vector.broadcast %cst_49 : f32 to vector<2x128xf32>
          %98 = arith.select %90, %96, %97 : vector<2x128xi1>, vector<2x128xf32>
          %cst_50 = arith.constant dense<true> : vector<2x128xi1>
          %99 = arith.xori %90, %cst_50 : vector<2x128xi1>
          %cst_51 = arith.constant dense<true> : vector<2x128xi1>
          %100 = arith.xori %87, %cst_51 : vector<2x128xi1>
          %101 = arith.andi %99, %100 : vector<2x128xi1>
          %cst_52 = arith.constant 4.000000e+00 : f32
          %102 = vector.broadcast %cst_52 : f32 to vector<2x128xf32>
          %103 = arith.addf %102, %84 : vector<2x128xf32>
          %104 = arith.subf %103, %82 : vector<2x128xf32>
          %cst_53 = arith.constant 0.000000e+00 : f32
          %105 = vector.broadcast %cst_53 : f32 to vector<2x128xf32>
          %106 = arith.select %101, %104, %105 : vector<2x128xi1>, vector<2x128xf32>
          %107 = arith.addf %93, %98 : vector<2x128xf32>
          %108 = arith.addf %107, %106 : vector<2x128xf32>
          %cst_54 = arith.constant 6.000000e+00 : f32
          %109 = vector.broadcast %cst_54 : f32 to vector<2x128xf32>
          %110 = arith.divf %108, %109 : vector<2x128xf32>
          %cst_55 = arith.constant 1.000000e+00 : f32
          %111 = vector.broadcast %cst_55 : f32 to vector<2x128xf32>
          %112 = arith.addf %110, %111 : vector<2x128xf32>
          %113 = math.floor %112 : vector<2x128xf32>
          %114 = arith.subf %112, %113 : vector<2x128xf32>
          %115 = vector.broadcast %34 : f32 to vector<2x128xf32>
          %116 = arith.addf %114, %115 : vector<2x128xf32>
          %117 = math.floor %116 : vector<2x128xf32>
          %118 = arith.subf %116, %117 : vector<2x128xf32>
          %cst_56 = arith.constant 6.000000e+00 : f32
          %119 = vector.broadcast %cst_56 : f32 to vector<2x128xf32>
          %120 = arith.mulf %118, %119 : vector<2x128xf32>
          %121 = math.floor %120 : vector<2x128xf32>
          %122 = arith.subf %120, %121 : vector<2x128xf32>
          %cst_57 = arith.constant 1.000000e+00 : f32
          %123 = vector.broadcast %cst_57 : f32 to vector<2x128xf32>
          %124 = arith.subf %123, %80 : vector<2x128xf32>
          %125 = arith.mulf %69, %124 : vector<2x128xf32>
          %cst_58 = arith.constant 0.000000e+00 : f32
          %cst_59 = arith.constant 1.000000e+00 : f32
          %126 = vector.broadcast %cst_58 : f32 to vector<2x128xf32>
          %127 = arith.maximumf %126, %125 : vector<2x128xf32>
          %128 = vector.broadcast %cst_59 : f32 to vector<2x128xf32>
          %129 = arith.minimumf %128, %127 : vector<2x128xf32>
          %130 = arith.mulf %80, %122 : vector<2x128xf32>
          %cst_60 = arith.constant 1.000000e+00 : f32
          %131 = vector.broadcast %cst_60 : f32 to vector<2x128xf32>
          %132 = arith.subf %131, %130 : vector<2x128xf32>
          %133 = arith.mulf %69, %132 : vector<2x128xf32>
          %cst_61 = arith.constant 0.000000e+00 : f32
          %cst_62 = arith.constant 1.000000e+00 : f32
          %134 = vector.broadcast %cst_61 : f32 to vector<2x128xf32>
          %135 = arith.maximumf %134, %133 : vector<2x128xf32>
          %136 = vector.broadcast %cst_62 : f32 to vector<2x128xf32>
          %137 = arith.minimumf %136, %135 : vector<2x128xf32>
          %cst_63 = arith.constant 1.000000e+00 : f32
          %138 = vector.broadcast %cst_63 : f32 to vector<2x128xf32>
          %139 = arith.subf %138, %122 : vector<2x128xf32>
          %140 = arith.mulf %80, %139 : vector<2x128xf32>
          %cst_64 = arith.constant 1.000000e+00 : f32
          %141 = vector.broadcast %cst_64 : f32 to vector<2x128xf32>
          %142 = arith.subf %141, %140 : vector<2x128xf32>
          %143 = arith.mulf %69, %142 : vector<2x128xf32>
          %cst_65 = arith.constant 0.000000e+00 : f32
          %cst_66 = arith.constant 1.000000e+00 : f32
          %144 = vector.broadcast %cst_65 : f32 to vector<2x128xf32>
          %145 = arith.maximumf %144, %143 : vector<2x128xf32>
          %146 = vector.broadcast %cst_66 : f32 to vector<2x128xf32>
          %147 = arith.minimumf %146, %145 : vector<2x128xf32>
          %cst_67 = arith.constant 0.000000e+00 : f32
          %148 = vector.broadcast %cst_67 : f32 to vector<2x128xf32>
          %149 = arith.cmpf oeq, %121, %148 : vector<2x128xf32>
          %cst_68 = arith.constant 1.000000e+00 : f32
          %150 = vector.broadcast %cst_68 : f32 to vector<2x128xf32>
          %151 = arith.cmpf oeq, %121, %150 : vector<2x128xf32>
          %cst_69 = arith.constant 2.000000e+00 : f32
          %152 = vector.broadcast %cst_69 : f32 to vector<2x128xf32>
          %153 = arith.cmpf oeq, %121, %152 : vector<2x128xf32>
          %cst_70 = arith.constant 3.000000e+00 : f32
          %154 = vector.broadcast %cst_70 : f32 to vector<2x128xf32>
          %155 = arith.cmpf oeq, %121, %154 : vector<2x128xf32>
          %cst_71 = arith.constant 4.000000e+00 : f32
          %156 = vector.broadcast %cst_71 : f32 to vector<2x128xf32>
          %157 = arith.cmpf oeq, %121, %156 : vector<2x128xf32>
          %158 = arith.select %157, %147, %69 : vector<2x128xi1>, vector<2x128xf32>
          %159 = arith.select %155, %129, %158 : vector<2x128xi1>, vector<2x128xf32>
          %160 = arith.select %153, %129, %159 : vector<2x128xi1>, vector<2x128xf32>
          %161 = arith.select %151, %137, %160 : vector<2x128xi1>, vector<2x128xf32>
          %162 = arith.select %149, %69, %161 : vector<2x128xi1>, vector<2x128xf32>
          %163 = arith.select %157, %129, %129 : vector<2x128xi1>, vector<2x128xf32>
          %164 = arith.select %155, %137, %163 : vector<2x128xi1>, vector<2x128xf32>
          %165 = arith.select %153, %69, %164 : vector<2x128xi1>, vector<2x128xf32>
          %166 = arith.select %151, %69, %165 : vector<2x128xi1>, vector<2x128xf32>
          %167 = arith.select %149, %147, %166 : vector<2x128xi1>, vector<2x128xf32>
          %168 = arith.select %157, %69, %137 : vector<2x128xi1>, vector<2x128xf32>
          %169 = arith.select %155, %69, %168 : vector<2x128xi1>, vector<2x128xf32>
          %170 = arith.select %153, %147, %169 : vector<2x128xi1>, vector<2x128xf32>
          %171 = arith.select %151, %129, %170 : vector<2x128xi1>, vector<2x128xf32>
          %172 = arith.select %149, %129, %171 : vector<2x128xi1>, vector<2x128xf32>
          scf.yield %162, %167, %172 : vector<2x128xf32>, vector<2x128xf32>, vector<2x128xf32>
        }
        scf.yield %67#0, %67#1, %67#2 : vector<2x128xf32>, vector<2x128xf32>, vector<2x128xf32>
      }
      scf.yield %63#0, %63#1, %63#2 : vector<2x128xf32>, vector<2x128xf32>, vector<2x128xf32>
    }
    %c4_i32_21 = arith.constant 4 : i32
    %cst_22 = arith.constant 4.850000e-01 : f32
    %37 = vector.broadcast %cst_22 : f32 to vector<2x128xf32>
    %38 = arith.subf %36#0, %37 : vector<2x128xf32>
    %cst_23 = arith.constant 4.36681223 : f32
    %39 = vector.broadcast %cst_23 : f32 to vector<2x128xf32>
    %40 = arith.mulf %38, %39 : vector<2x128xf32>
    %c0_24 = arith.constant 0 : index
    %c0_25 = arith.constant 0 : index
    %c0_26 = arith.constant 0 : index
    %c0_27 = arith.constant 0 : index
    %41 = vector.load %arg4[%c0_24, %c0_25, %c0_26, %c0_27] : memref<1x3x2x128xf32, #tpu.memory_space<vmem>>, vector<1x1x2x128xf32>
    %42 = vector.shape_cast %41 : vector<1x1x2x128xf32> to vector<2x128xf32>
    %43 = vector.shape_cast %40 : vector<2x128xf32> to vector<1x1x2x128xf32>
    tpu.vector_store %arg4[%c0_24, %c0_25, %c0_26, %c0_27], %43 {strides = array<i32>} : memref<1x3x2x128xf32, #tpu.memory_space<vmem>>, vector<1x1x2x128xf32>,
    %cst_28 = arith.constant 4.560000e-01 : f32
    %44 = vector.broadcast %cst_28 : f32 to vector<2x128xf32>
    %45 = arith.subf %36#1, %44 : vector<2x128xf32>
    %cst_29 = arith.constant 4.46428585 : f32
    %46 = vector.broadcast %cst_29 : f32 to vector<2x128xf32>
    %47 = arith.mulf %45, %46 : vector<2x128xf32>
    %c0_30 = arith.constant 0 : index
    %c1_31 = arith.constant 1 : index
    %c0_32 = arith.constant 0 : index
    %c0_33 = arith.constant 0 : index
    %48 = vector.load %arg4[%c0_30, %c1_31, %c0_32, %c0_33] : memref<1x3x2x128xf32, #tpu.memory_space<vmem>>, vector<1x1x2x128xf32>
    %49 = vector.shape_cast %48 : vector<1x1x2x128xf32> to vector<2x128xf32>
    %50 = vector.shape_cast %47 : vector<2x128xf32> to vector<1x1x2x128xf32>
    tpu.vector_store %arg4[%c0_30, %c1_31, %c0_32, %c0_33], %50 {strides = array<i32>} : memref<1x3x2x128xf32, #tpu.memory_space<vmem>>, vector<1x1x2x128xf32>,
    %cst_34 = arith.constant 4.060000e-01 : f32
    %51 = vector.broadcast %cst_34 : f32 to vector<2x128xf32>
    %52 = arith.subf %36#2, %51 : vector<2x128xf32>
    %cst_35 = arith.constant 4.44444466 : f32
    %53 = vector.broadcast %cst_35 : f32 to vector<2x128xf32>
    %54 = arith.mulf %52, %53 : vector<2x128xf32>
    %c0_36 = arith.constant 0 : index
    %c2_37 = arith.constant 2 : index
    %c0_38 = arith.constant 0 : index
    %c0_39 = arith.constant 0 : index
    %55 = vector.load %arg4[%c0_36, %c2_37, %c0_38, %c0_39] : memref<1x3x2x128xf32, #tpu.memory_space<vmem>>, vector<1x1x2x128xf32>
    %56 = vector.shape_cast %55 : vector<1x1x2x128xf32> to vector<2x128xf32>
    %57 = vector.shape_cast %54 : vector<2x128xf32> to vector<1x1x2x128xf32>
    tpu.vector_store %arg4[%c0_36, %c2_37, %c0_38, %c0_39], %57 {strides = array<i32>} : memref<1x3x2x128xf32, #tpu.memory_space<vmem>>, vector<1x1x2x128xf32>,
    return
  }
  func.func @transform_0(%arg0: i32) -> i32 {
    %c0_i32 = arith.constant 0 : i32
    %c0_i32_0 = arith.constant 0 : i32
    return %c0_i32 : i32
  }
  func.func @transform_1(%arg0: i32) -> i32 {
    %c0_i32 = arith.constant 0 : i32
    %c0_i32_0 = arith.constant 0 : i32
    return %c0_i32 : i32
  }
  func.func @transform_2(%arg0: i32) -> (i32, i32, i32, i32) {
    %c0_i32 = arith.constant 0 : i32
    %c0_i32_0 = arith.constant 0 : i32
    %c0_i32_1 = arith.constant 0 : i32
    %c0_i32_2 = arith.constant 0 : i32
    return %arg0, %c0_i32, %c0_i32_0, %c0_i32_1 : i32, i32, i32, i32
  }
  func.func @transform_3(%arg0: i32) -> (i32, i32, i32, i32) {
    %c0_i32 = arith.constant 0 : i32
    %c0_i32_0 = arith.constant 0 : i32
    %c0_i32_1 = arith.constant 0 : i32
    %c0_i32_2 = arith.constant 0 : i32
    return %arg0, %c0_i32, %c0_i32_0, %c0_i32_1 : i32, i32, i32, i32
  }
}

</mosaic_0001>

<bundles_post_ra>
// kernel: tpu_custom_call.1
= control target key start
LH: loop header
LB: loop body
LE: loop exit
PB: predicated region body
PF: predicated region fallthrough
CT: control target
= control target key end

     0   :  { %s1481_s0 = inlined_call_operand.hbm [shape: s32[4], index: 0, kind: input, shape index: {}]   ;;  %s1482_s1 = inlined_call_operand.hbm [shape: f32[8], index: 1, kind: input, shape index: {}]   ;;  %s1483_s2 = inlined_call_operand.hbm [shape: f32[2,3,2,128], index: 2, kind: input, shape index: {}]   ;;  %s1484_s3 = inlined_call_operand.hbm [shape: f32[2,3,2,128], index: 3, kind: output, shape index: {}]  }
   0x1   :  { %1485 = sst [smem:[#allocation14_spill]] %s1481_s0 }
   0x2   :  { %1486 = sst [smem:[#allocation15_spill]] %s1482_s1 }
   0x3   :  { %8 = vsyncpa [#allocation5], 0 }
   0x4   :  { %9 = vsyncpa [#allocation7], 0 }
   0x5   :  { %10 = vsyncpa [#allocation3], 0 }
   0x6   :  { %12 = vsyncpa [#allocation3 + $0x1], 0 }
   0x7   :  { %13 = vsyncpa [#allocation4], 0 }
   0x8   :  { %15 = vsyncpa [#allocation4 + $0x1], 0  ;;  %s1121_s12 = smov 0   ;;  %s1123_s13 = smov 0  }
   0x9   :  { %s1125_s14 = smov 0   ;;  %s1127_s15 = smov 0  }
   0xa LB: > { %s1142_s16 = sadd.s32 4294967295, %s1039_s15   ;;  %s595_s17 = sadd.s32 4294967294, %s1039_s15   ;;  %s1039_s15 = sphi %s1127_s15, %s1515_s15   ;;  %s1035_s14 = sphi %s1125_s14, %s1514_s14   ;;  %s1031_s13 = sphi %s1123_s13, %s1513_s13   ;;  %s1027_s12 = sphi %s1121_s12, %s1512_s12  }
   0xb   : > { %s1146_s18 = sadd.s32 1, %s1039_s15   ;;  %s70_s19 = sadd.s32 1, %s1035_s14 }
   0xc   : > { %s67_s20 = ssub.s32 %s1039_s15, %s1146_s18  ;;  %p77_p0 = scmp.ne.s32.totalorder %s1035_s14, %s1031_s13 }
   0xd   : > { %p68_p1 = scmp.eq.s32.totalorder %s67_s20, 0  ;;  %p78_p2 = scmp.eq.s32.totalorder %s1039_s15, 0 }
   0xe   : > { %p83_p3 = scmp.ne.s32.totalorder %s1031_s13, %s1027_s12  ;;  %p84_p4 = scmp.eq.s32.totalorder %s1142_s16, 0 }
   0xf   : > { %s1158_s21 = scalar_select %p68_p1, %s1035_s14, %s70_s19  }
  0x10   : > { %p1160_p5 = por %p78_p2, %p77_p0  ;;  %p1166_p6 = por %p84_p4, %p83_p3 }
  0x11   : > { %p107_p7 = scmp.eq.s32.totalorder %s1142_s16, 1  ;;  %p113_p8 = scmp.eq.s32.totalorder %s595_s17, 1 }
  0x12   : > { %p596_p9 = scmp.ge.s32.totalorder %s1039_s15, 1  ;;  %p120_p10 = scmp.lt.s32.totalorder %s1039_s15, 3 }
  0x13   : > { %p1173_p11 = por %p107_p7, %p77_p0  ;;  %p1177_p12 = por %p113_p8, %p83_p3 }
  0x14   : > { %p1181_p13 = pnand %p596_p9, %p120_p10  ;;  %s1492_s0 = sld [smem:[#allocation14_spill]] }
  0x15   : > { %p696_p2 = scmp.lt.s32.totalorder %s1039_s15, 2  ;;  %s1493_s1 = sld [smem:[#allocation15_spill]] }
  0x16   : > { %p679_p1 = pneg %p1181_p13  ;;  %s1093_s7 = smov [#allocation2]  }
  0x17   : > { %p1199_p7 = pnand %p696_p2, %p1160_p5  ;;  %s153_s8 = sand.u32 1, %s1035_s14  }
  0x18   : > { %p680_p3 = pnand %p679_p1, %p84_p4  ;;  %s1094_s9 = smov [#allocation6]  }
  0x19   : > { %s618_s10 = smul.u32 6, %s153_s8  ;;  %s154_s30 = scalar_lea.sflag [#allocation3], %s153_s8 }
  0x1a   : > { %s132_s29 = sshll.u32 %s1492_s0, 4  ;;  %s619_s11 = smul.u32 6, %s1039_s15  ;;  %s133_s29 = int_to_ptr.hbm [resolvable:$true] %s132_s29 }
  0x1b   : > { %s142_s5 = sshll.u32 %s1493_s1, 4  ;;  %s157_s27 = scalar_lea.vmem [#allocation8], %s618_s10  ;;  %s143_s5 = int_to_ptr.hbm [resolvable:$true] %s142_s5 }
  0x1c   : > { %682 = dma.hbm_to_smem (!%p680_p3), %s133_s29, 16, %s1093_s7, [#allocation5]  }
  0x1d   : > { %685 = dma.hbm_to_smem (!%p680_p3), %s143_s5, 16, %s1094_s9, [#allocation7]  }
  0x1e   : > { %s162_s20 = scalar_lea.hbm %s1483_s2, %s619_s11  ;;  %s165_s28 = sshll.u32 %s157_s27, 4  ;;  %s166_s28 = int_to_ptr.vmem [resolvable:$true] %s165_s28 }
  0x1f   : > { %s163_s22 = sshll.u32 %s162_s20, 4  ;;  %p887_p8 = pneg %p1199_p7  ;;  %s164_s22 = int_to_ptr.hbm [resolvable:$true] %s163_s22 }
  0x20   : > { %s883_s4 = sshra.s32 %s164_s22, 4  ;;  %s890_s7 = scalar_lea.hbm %s1483_s2, 12  ;;  %s884_s4 = int_to_ptr.hbm [resolvable:$true] %s883_s4 }
  0x21   : > { %s885_s0 = scalar_lea.hbm %s884_s4, 6  ;;  %p891_p1 = scmp.lt.s32.totalorder %s884_s4, %s1483_s2 }
  0x22   : > { %p886_p5 = scmp.ne.s32.totalorder %s884_s4, %s885_s0  ;;  %p892_p2 = scmp.lt.s32.totalorder %s890_s7, %s885_s0 }
  0x24   : > { %p888_p9 = pnand %p887_p8, %p886_p5  ;;  %p893_p3 = por %p892_p2, %p891_p1 }
  0x26   : > { %p889_p10 = pneg %p888_p9 }
  0x28   : > { %p894_p0 = pnand %p893_p3, %p889_p10 }
  0x2a   : > { %897 = shalt.err (!%p894_p0)
}
  0x2b   : > { %s1095_s8 = smov 32   ;;  %s1096_s10 = smov 2  }
  0x2c   : > { %689 = dma.hbm_to_vmem [thread:$0]  (!%p1199_p7), %s164_s22, 96, %s166_s28, %s154_s30, %s1095_s8, %s1095_s8, %s1096_s10  }
  0x2d   : > { %177 = sbr.rel (%p1181_p13) target bundleno = 386 (0x182), region = 32 }
  0x32   : > { %1010 = dma.done.wait (%p84_p4), [#allocation5], 16  }
  0x33   : > { %1012 = vsyncadd (%p84_p4), [#allocation5], 4294967280 }
  0x34   : > { %1014 = dma.done.wait (%p84_p4), [#allocation7], 16  }
  0x35   : > { %1016 = vsyncadd (%p84_p4), [#allocation7], 4294967280  ;;  %s1229_s0 = sand.u32 1, %s1031_s13  }
  0x36   : > { %s620_s26 = smul.u32 6, %s1229_s0  ;;  %s190_s6 = scalar_lea.sflag [#allocation3], %s1229_s0 }
  0x38   : > { %s193_s17 = scalar_lea.vmem [#allocation8], %s620_s26 }
  0x39   : > { %1018 = dma.done.wait (%p1166_p6), %s190_s6, 96  }
  0x3a   : > { %1020 = vsyncadd (%p1166_p6), %s190_s6, 4294967200 }
  0x3b   : > { %199 = sfence }
  0x3c   : > { %v218_v0 = vld [vmem:[%s193_s17] sm:$0x3]  ;;  %v604_v1 = vld [vmem:[%s193_s17 + $0x2] sm:$0x3]  ;;  %s606_s19 = sshll.u32 %s1142_s16, 2  ;;  %s1250_s11 = scalar_lea.vmem [#allocation9], %s620_s26 }
  0x3d   : > { %v219_v2 = vmul.f32 0.229, %v218_v0  ;;  %v223_v3 = vmul.f32 0.224, %v604_v1  ;;  %v605_v4 = vld [vmem:[%s193_s17 + $0x4] sm:$0x3] }
  0x3e   : > { %v227_v5 = vmul.f32 0.225, %v605_v4  ;;  %s1238_s20 = sld [smem:[#allocation6 + %s606_s19]]  ;;  %s232_s27 = sadd.s32 1, %s606_s19 }
  0x3f   : > { %v220_v6 = vadd.f32 0.485, %v219_v2   ;;  %v224_v7 = vadd.f32 0.456, %v223_v3   ;;  %s1240_s28 = sld [smem:[#allocation6 + %s232_s27]]  ;;  %s235_s23 = sadd.s32 2, %s606_s19 }
  0x40   : > { %v228_v8 = vadd.f32 0.406, %v227_v5   ;;  %s1242_s22 = sld [smem:[#allocation6 + %s235_s23]]  ;;  %s238_s30 = sadd.s32 3, %s606_s19 }
  0x41   : > { %s1244_s4 = sld [smem:[#allocation6 + %s238_s30]]  ;;  %s1258_s8 = smov 0  }
  0x45   : > { %s234_s5 = sadd.f32 1.0, %s1240_s28 }
  0x46 LB: >> { %s1273_s10 = sld [smem:[#allocation2 + %s1055_s8]]  ;;  %v1277_v9 = vmov 0   ;;  %v1279_v10 = vmov 0   ;;  %v1281_v11 = vmov 0   ;;  %s1055_s8 = sphi %s1258_s8, %s246_s8   ;;  %v1051_v6 = vphi %v220_v6, %v1510_v6   ;;  %v1047_v7 = vphi %v224_v7, %v1509_v7   ;;  %v1043_v8 = vphi %v228_v8, %v1508_v8  }
  0x4c   : >> { %p251_p4 = scmp.lt.s32.totalorder %s1273_s10, 2  ;;  %p607_p6 = scmp.ge.s32.totalorder %s1273_s10, 2 }
  0x4d   : >> { %p255_p13 = scmp.eq.s32.totalorder (!%p607_p6), %s1273_s10, 0  ;;  %s1495_s29 = sadd.f32 (!%p607_p6), 1.0, %s1238_s20 }
  0x4e   : >> { %254 = sbr.rel (%p607_p6) target bundleno = 296 (0x128), region = 55 }
  0x53   : >> { %v259_v12 = vstv %s1495_s29  ;;  %s639_s26 = scalar_select %p255_p13, 1, 0 }
  0x54   : >> { %v260_v13 = vmul.f32 %v1051_v6, %v259_v12  ;;  %v263_v14 = vmul.f32 %v1047_v7, %v259_v12  ;;  %v266_v15 = vmul.f32 %v1043_v8, %v259_v12  ;;  %s314_s29 = ssub.f32 (!%p255_p13), 1.0, %s234_s5 }
  0x55   : >> { %v640_v19 = vstv %s639_s26 }
  0x56   : >> { %v261_v16 = vmax.f32 %v260_v13, 0.0  ;;  %v264_v17 = vmax.f32 %v263_v14, 0.0  ;;  %v267_v18 = vmax.f32 %v266_v15, 0.0  ;;  %vm641_vm0 = vcmp.ne.s32.totalorder %v640_v19, 0  ;;  %274 = sbr.rel (%p255_p13) target bundleno = 295 (0x127), region = 63 }
  0x58   : >> { %v262_v20 = vmin.f32 %v261_v16, 1.0  ;;  %v265_v21 = vmin.f32 %v264_v17, 1.0  ;;  %v268_v22 = vmin.f32 %v267_v18, 1.0 }
  0x5a   : >> { %v642_v23 = vsel %vm641_vm0, %v262_v20, 0   ;;  %v646_v24 = vsel %vm641_vm0, %v265_v21, 0   ;;  %v650_v25 = vsel %vm641_vm0, %v268_v22, 0  }
  0x5b   : >> { %vm275_vm1 = vcmask 1041408   ;;  %v312_v50 = vstv %s234_s5 }
  0x5c   : >> { %v276_v26 = vsel %vm275_vm1, %v1051_v6, 0.0  ;;  %v299_v27 = vsel %vm275_vm1, %v1043_v8, 0.0  ;;  %v287_v28 = vsel %vm275_vm1, %v1047_v7, 0.0  ;;  %v313_v51 = vmul.f32 %v1051_v6, %v312_v50 }
  0x5d   : >> { %277 = vadd.xlane.f32.xlu0 %v276_v26  ;;  %300 = vadd.xlane.f32.xlu1 %v299_v27  ;;  %v320_v52 = vmul.f32 %v1047_v7, %v312_v50  ;;  %v324_v53 = vmul.f32 %v1043_v8, %v312_v50 }
  0x65   : >> { %288 = vadd.xlane.f32.xlu0 %v287_v28 }
  0xd0   : >> { %v278_v29 = vpop.xlane.xlu0 %277  ;;  %v301_v30 = vpop.xlane.xlu1 %300 }
  0xd1   : >> { %v279_v31 = vrot.slane %v278_v29, 4  ;;  %v302_v32 = vrot.slane %v301_v30, 4 }
  0xd3   : >> { %v280_v33 = vadd.f32 %v279_v31, %v278_v29  ;;  %v303_v34 = vadd.f32 %v302_v32, %v301_v30 }
  0xd5   : >> { %v281_v35 = vrot.slane %v280_v33, 2  ;;  %v304_v37 = vrot.slane %v303_v34, 2 }
  0xd7   : >> { %v282_v36 = vadd.f32 %v281_v35, %v280_v33  ;;  %v305_v43 = vadd.f32 %v304_v37, %v303_v34 }
  0xd8   : >> { %v289_v38 = vpop.xlane.xlu0 %288 }
  0xd9   : >> { %v290_v39 = vrot.slane %v289_v38, 4  ;;  %v283_v40 = vrot.slane %v282_v36, 1  ;;  %v306_v46 = vrot.slane %v305_v43, 1 }
  0xdb   : >> { %v291_v41 = vadd.f32 %v290_v39, %v289_v38  ;;  %v284_v42 = vadd.f32 %v283_v40, %v282_v36  ;;  %v307_v49 = vadd.f32 %v306_v46, %v305_v43 }
  0xdd   : >> { %v292_v44 = vrot.slane %v291_v41, 2  ;;  %621 = vpush %v284_v42 }
  0xdf   : >> { %v293_v45 = vadd.f32 %v292_v44, %v291_v41 }
  0xe1   : >> { %v294_v47 = vrot.slane %v293_v45, 1 }
  0xe3   : >> { %v295_v48 = vadd.f32 %v294_v47, %v293_v45 }
  0xe5   : >> { %623 = vpush %v295_v48 }
  0xe6   : >> { %625 = vpush %v307_v49 }
 0x10e   : >> { %s622_s6 = spop %621 }
 0x10f   : >> { %s286_s17 = smul.f32 0.2989, %s622_s6 }
 0x116   : >> { %s624_s19 = spop %623 }
 0x117   : >> { %s297_s27 = smul.f32 0.587, %s624_s19  ;;  %s626_s23 = spop %625 }
 0x118   : >> { %s309_s26 = smul.f32 0.114, %s626_s23 }
 0x119   : >> { %s298_s30 = sadd.f32 %s297_s27, %s286_s17 }
 0x11b   : >> { %s310_s7 = sadd.f32 %s309_s26, %s298_s30 }
 0x11d   : >> { %s311_s9 = smul.f32 0.00390625, %s310_s7 }
 0x11f   : >> { %s315_s1 = smul.f32 %s314_s29, %s311_s9 }
 0x121   : >> { %v316_v54 = vstv %s315_s1 }
 0x122   : >> { %v317_v55 = vadd.f32 %v316_v54, %v313_v51  ;;  %v321_v56 = vadd.f32 %v320_v52, %v316_v54  ;;  %v325_v57 = vadd.f32 %v324_v53, %v316_v54 }
 0x124   : >> { %v318_v58 = vmax.f32 %v317_v55, 0.0  ;;  %v322_v59 = vmax.f32 %v321_v56, 0.0  ;;  %v326_v60 = vmax.f32 %v325_v57, 0.0 }
 0x126   : >> { %v319_v23 = vmin.f32 %v318_v58, 1.0   ;;  %v323_v24 = vmin.f32 %v322_v59, 1.0   ;;  %v327_v25 = vmin.f32 %v326_v60, 1.0  }
 0x127 PF: >> { %v1496_v9 = vmov %v1059_v25  ;;  %v1497_v10 = vmov %v1063_v24  ;;  %v1498_v11 = vmov %v1067_v23  ;;  %v1067_v23 = vphi %v642_v23, %v319_v23   ;;  %v1063_v24 = vphi %v646_v24, %v323_v24   ;;  %v1059_v25 = vphi %v650_v25, %v327_v25  }
 0x128 PF: >> { %336 = sbr.rel (%p251_p4) target bundleno = 365 (0x16d), region = 67  ;;  %s1504_s29 = sadd.f32 (!%p251_p4), 1.0, %s1242_s22  ;;  %v1079_v11 = vphi %v1281_v11, %v1498_v11   ;;  %v1075_v10 = vphi %v1279_v10, %v1497_v10   ;;  %v1071_v9 = vphi %v1277_v9, %v1496_v9  }
 0x129   : >> { %s1503_s1 = smul.f32 (!%p251_p4), 0.5, %s1244_s4  ;;  %p337_p0 = scmp.eq.s32.totalorder (!%p251_p4), %s1273_s10, 2 }
 0x12a   : >> { %s348_s7 = ssub.f32 (!%p251_p4), 1.0, %s1504_s29  ;;  %s1505_s9 = smov (!%p251_p4), %s1504_s29 }
 0x12b   : >> { %p609_p7 = scmp.ne.s32.totalorder (!%p251_p4), %s1273_s10, 2 }
 0x12d   : >> { %v368_v61 = vmax.f32 %v1051_v6, %v1047_v7  ;;  %v370_v63 = vmin.f32 %v1051_v6, %v1047_v7  ;;  %v1097_v2 = vmov 6.0   ;;  %vm1098_vm5 = vmmov 1   ;;  %s652_s6 = scalar_select %p337_p0, 1, 0 }
 0x12e   : >> { %847 = vrcp.f32 %v1097_v2  ;;  %v341_v35 = vmul.f32 0.2989, %v1051_v6  ;;  %v342_v36 = vmul.f32 0.587, %v1047_v7  ;;  %v412_v38 = vstv %s1503_s1  ;;  %s665_s17 = scalar_select %p609_p7, 1, 0 }
 0x12f   : >> { %v1338_v62 = vmax.f32 %v368_v61, %v1043_v8  ;;  %v371_v0 = vmin.f32 %v370_v63, %v1043_v8  ;;  %v344_v41 = vmul.f32 0.114, %v1043_v8  ;;  %v346_v46 = vstv %s1505_s9 }
 0x130   : >> { %v343_v40 = vadd.f32 %v342_v36, %v341_v35  ;;  %v349_v47 = vstv %s348_s7  ;;  %v354_v53 = vmul.f32 %v1047_v7, %v346_v46  ;;  %v358_v54 = vmul.f32 %v1043_v8, %v346_v46 }
 0x131   : >> { %v372_v1 = vsub.f32 %v1338_v62, %v371_v0  ;;  %vm385_vm3 = vcmp.eq.f32.partialorder %v1338_v62, %v1051_v6  ;;  %vm386_vm4 = vcmp.eq.f32.partialorder %v1338_v62, %v1047_v7  ;;  %v379_v10 = vsub.f32 %v1338_v62, %v1051_v6 }
 0x132   : >> { %vm1352_vm6 = vmxor %vm385_vm3, %vm1098_vm5  ;;  %v381_v11 = vsub.f32 %v1338_v62, %v1047_v7  ;;  %v383_v12 = vsub.f32 %v1338_v62, %v1043_v8  ;;  %v345_v45 = vadd.f32 %v344_v41, %v343_v40  ;;  %v347_v56 = vmul.f32 %v1051_v6, %v346_v46 }
 0x133   : >> { %vm373_vm2 = vcmp.eq.f32.partialorder %v372_v1, 0.0  ;;  %vm1364_vm7 = vmand %vm386_vm4, %vm1352_vm6  ;;  %v653_v5 = vstv %s652_s6 }
 0x134   : >> { %v376_v3 = vsel %vm373_vm2, 1.0, %v372_v1  ;;  %v848_v4 = vpop.eup %847  ;;  %vm394_vm8 = vmxor %vm1364_vm7, %vm1098_vm5  ;;  %v374_v32 = vsel %vm373_vm2, 1.0, %v1338_v62  ;;  %v350_v52 = vmul.f32 %v349_v47, %v345_v45  ;;  %vm1395_vm11 = vcmp.ne.s32.totalorder %v653_v5, 0 }
 0x135   : >> { %849 = vrcp.f32 %v376_v3  ;;  %v402_v9 = vmul.f32 6.0, %v848_v4  ;;  %vm395_vm9 = vmand %vm394_vm8, %vm1352_vm6  ;;  %vm406_vm10 = vweird.f32 %v848_v4 }
 0x136   : >> { %851 = vrcp.f32 %v374_v32  ;;  %v355_v59 = vadd.f32 %v354_v53, %v350_v52  ;;  %v359_v60 = vadd.f32 %v358_v54, %v350_v52  ;;  %v351_v0 = vadd.f32 %v350_v52, %v347_v56 }
 0x137   : >> { %v403_v14 = vsub.f32 1.0, %v402_v9 }
 0x138   : >> { %v360_v7 = vmax.f32 %v359_v60, 0.0  ;;  %v352_v6 = vmax.f32 %v351_v0, 0.0 }
 0x139   : >> { %v404_v19 = vmul.f32 %v848_v4, %v403_v14 }
 0x13b   : >> { %v850_v15 = vpop.eup %849  ;;  %v405_v26 = vadd.f32 %v848_v4, %v404_v19  ;;  %v353_v19 = vmin.f32 %v352_v6, 1.0 }
 0x13c   : >> { %v380_v16 = vmul.f32 %v850_v15, %v379_v10  ;;  %v382_v17 = vmul.f32 %v850_v15, %v381_v11  ;;  %v384_v18 = vmul.f32 %v850_v15, %v383_v12  ;;  %v852_v43 = vpop.eup %851  ;;  %v361_v15 = vmin.f32 %v360_v7, 1.0 }
 0x13d   : >> { %v407_v30 = vsel %vm406_vm10, %v848_v4, %v405_v26  ;;  %v378_v48 = vmul.f32 %v852_v43, %v372_v1  ;;  %v356_v4 = vmax.f32 %v355_v59, 0.0 }
 0x13e   : >> { %v389_v20 = vsub.f32 %v384_v18, %v382_v17  ;;  %v391_v21 = vadd.f32 2.0, %v380_v16  ;;  %v396_v22 = vadd.f32 4.0, %v382_v17  ;;  %v663_v26 = vsel %vm1395_vm11, %v361_v15, 0 }
 0x13f   : >> { %v419_v51 = vsub.f32 1.0, %v378_v48  ;;  %v357_v14 = vmin.f32 %v356_v4, 1.0 }
 0x140   : >> { %v390_v23 = vsel %vm385_vm3, %v389_v20, 0.0  ;;  %v392_v24 = vsub.f32 %v391_v21, %v384_v18  ;;  %v397_v25 = vsub.f32 %v396_v22, %v380_v16  ;;  %v666_v18 = vstv %s665_s17 }
 0x141   : >> { %v420_v58 = vmul.f32 %v419_v51, %v1338_v62  ;;  %vm667_vm1 = vcmp.ne.s32.totalorder %v666_v18, 0 }
 0x142   : >> { %v393_v27 = vsel %vm1364_vm7, %v392_v24, 0.0  ;;  %v398_v28 = vsel %vm395_vm9, %v397_v25, 0.0 }
 0x143   : >> { %v399_v29 = vadd.f32 %v393_v27, %v390_v23  ;;  %v421_v1 = vmax.f32 %v420_v58, 0.0  ;;  %v659_v23 = vsel %vm1395_vm11, %v357_v14, 0 }
 0x145   : >> { %v400_v31 = vadd.f32 %v399_v29, %v398_v28  ;;  %v422_v11 = vmin.f32 %v421_v1, 1.0 }
 0x147   : >> { %v408_v33 = vmul.f32 %v407_v30, %v400_v31 }
 0x149   : >> { %v409_v34 = vadd.f32 1.0, %v408_v33  ;;  %v655_v33 = vsel %vm1395_vm11, %v353_v19, 0 }
 0x14b   : >> { %v410_v37 = vfloor.f32 %v409_v34 }
 0x14d   : >> { %v411_v39 = vsub.f32 %v409_v34, %v410_v37 }
 0x14f   : >> { %v413_v42 = vadd.f32 %v412_v38, %v411_v39 }
 0x151   : >> { %v414_v44 = vfloor.f32 %v413_v42 }
 0x153   : >> { %v415_v49 = vsub.f32 %v413_v42, %v414_v44 }
 0x155   : >> { %v416_v50 = vmul.f32 6.0, %v415_v49 }
 0x157   : >> { %v417_v55 = vfloor.f32 %v416_v50 }
 0x159   : >> { %v418_v57 = vsub.f32 %v416_v50, %v417_v55  ;;  %vm437_vm12 = vcmp.eq.f32.partialorder %v417_v55, 3.0  ;;  %vm438_vm13 = vcmp.eq.f32.partialorder %v417_v55, 4.0  ;;  %vm436_vm14 = vcmp.eq.f32.partialorder %v417_v55, 2.0 }
 0x15a   : >> { %vm435_vm15 = vcmp.eq.f32.partialorder %v417_v55, 1.0  ;;  %vm434_vm0 = vcmp.eq.f32.partialorder %v417_v55, 0.0 }
 0x15b   : >> { %v423_v61 = vmul.f32 %v418_v57, %v378_v48  ;;  %v428_v63 = vsub.f32 1.0, %v418_v57 }
 0x15d   : >> { %v424_v2 = vsub.f32 1.0, %v423_v61  ;;  %v429_v3 = vmul.f32 %v428_v63, %v378_v48 }
 0x15f   : >> { %v425_v8 = vmul.f32 %v424_v2, %v1338_v62  ;;  %v430_v9 = vsub.f32 1.0, %v429_v3 }
 0x161   : >> { %v426_v12 = vmax.f32 %v425_v8, 0.0  ;;  %v431_v13 = vmul.f32 %v430_v9, %v1338_v62 }
 0x163   : >> { %v427_v16 = vmin.f32 %v426_v12, 1.0  ;;  %v432_v17 = vmax.f32 %v431_v13, 0.0 }
 0x165   : >> { %v433_v20 = vmin.f32 %v432_v17, 1.0  ;;  %v444_v21 = vsel %vm437_vm12, %v427_v16, %v422_v11  ;;  %v448_v22 = vsel %vm438_vm13, %v1338_v62, %v427_v16 }
 0x166   : >> { %v445_v24 = vsel %vm436_vm14, %v1338_v62, %v444_v21  ;;  %v449_v25 = vsel %vm437_vm12, %v1338_v62, %v448_v22 }
 0x167   : >> { %v439_v27 = vsel %vm438_vm13, %v433_v20, %v1338_v62  ;;  %v446_v28 = vsel %vm435_vm15, %v1338_v62, %v445_v24  ;;  %v450_v29 = vsel %vm436_vm14, %v433_v20, %v449_v25 }
 0x168   : >> { %v440_v30 = vsel %vm437_vm12, %v422_v11, %v439_v27  ;;  %v447_v31 = vsel %vm434_vm0, %v433_v20, %v446_v28  ;;  %v451_v32 = vsel %vm435_vm15, %v422_v11, %v450_v29 }
 0x169   : >> { %v441_v34 = vsel %vm436_vm14, %v422_v11, %v440_v30  ;;  %v452_v35 = vsel %vm434_vm0, %v422_v11, %v451_v32  ;;  %v672_v10 = vsel %vm667_vm1, %v447_v31, %v659_v23  }
 0x16a   : >> { %v442_v36 = vsel %vm435_vm15, %v427_v16, %v441_v34  ;;  %v676_v9 = vsel %vm667_vm1, %v452_v35, %v663_v26  }
 0x16b   : >> { %v443_v37 = vsel %vm434_vm0, %v1338_v62, %v442_v36 }
 0x16c   : >> { %v668_v11 = vsel %vm667_vm1, %v443_v37, %v655_v33  }
 0x16d PF: >> { %s246_s8 = sadd.s32 1, %s1055_s8   ;;  %v1508_v8 = vmov %v1083_v9  ;;  %v1509_v7 = vmov %v1087_v10  ;;  %v1510_v6 = vmov %v1091_v11  ;;  %v1091_v11 = vphi %v1079_v11, %v668_v11   ;;  %v1087_v10 = vphi %v1075_v10, %v672_v10   ;;  %v1083_v9 = vphi %v1071_v9, %v676_v9  }
 0x16e   : >> { %p243_p5 = scmp.ge.s32.totalorder %s246_s8, 4  }
 0x16f   : > { %v610_v62 = vadd.f32 (%p243_p5), -0.485, %v1091_v11  ;;  %v611_v38 = vadd.f32 (%p243_p5), -0.456, %v1087_v10  ;;  %v613_v39 = vadd.f32 (%p243_p5), -0.406, %v1083_v9 }
 0x170   : > { %245 = sbr.rel (!%p243_p5) target bundleno = 70 (0x46), region = 121  ;;  %s483_s8 = sshll.u32 (%p243_p5), %s1250_s11, 4  ;;  %s484_s8 = int_to_ptr.vmem [resolvable:$true] %s483_s8 }
 0x171   : > { %s627_s10 = smul.u32 (%p243_p5), 6, %s1142_s16  ;;  %v460_v40 = vmul.f32 (%p243_p5), 4.366812, %v610_v62  ;;  %v463_v41 = vmul.f32 (%p243_p5), 4.464286, %v611_v38  ;;  %s471_s28 = scalar_lea.sflag (%p243_p5), [#allocation4], %s1229_s0 }
 0x172   : > { %v467_v42 = vmul.f32 (%p243_p5), 4.4444447, %v613_v39  ;;  %s933_s30 = scalar_lea.hbm (%p243_p5), %s1484_s3, 12 }
 0x173   : > { %s482_s23 = scalar_lea.hbm (%p243_p5), %s1484_s3, %s627_s10  ;;  %461 = vst [vmem:[%s1250_s11] sm:$0x3] (%p243_p5), %v460_v40 }
 0x174   : > { %s485_s20 = sshll.u32 (%p243_p5), %s482_s23, 4  ;;  %612 = vst [vmem:[%s1250_s11 + $0x2] sm:$0x3] (%p243_p5), %v463_v41  ;;  %s486_s20 = int_to_ptr.hbm [resolvable:$true] %s485_s20 }
 0x175   : > { %614 = vst [vmem:[%s1250_s11 + $0x4] sm:$0x3] %v467_v42  ;;  %s927_s22 = sshra.s32 %s486_s20, 4  ;;  %s928_s22 = int_to_ptr.hbm [resolvable:$true] %s927_s22 }
 0x176   : > { %s929_s4 = scalar_lea.hbm %s928_s22, 6  ;;  %p934_p1 = scmp.lt.s32.totalorder %s928_s22, %s1484_s3 }
 0x177   : > { %p930_p8 = scmp.ne.s32.totalorder %s928_s22, %s929_s4  ;;  %p935_p2 = scmp.lt.s32.totalorder %s933_s30, %s929_s4 }
 0x179   : > { %p931_p9 = pnand %p930_p8, %p1173_p11  ;;  %p936_p3 = por %p935_p2, %p934_p1 }
 0x17b   : > { %p932_p10 = pneg %p931_p9 }
 0x17d   : > { %p937_p4 = pnand %p936_p3, %p932_p10 }
 0x17f   : > { %940 = shalt.err (!%p937_p4)
}
 0x180   : > { %s1099_s0 = smov 32   ;;  %s1100_s11 = smov 2  }
 0x181   : > { %677 = dma.vmem_to_hbm [thread:$0]  (%p1173_p11), %s484_s8, 96, %s486_s20, %s471_s28, %s1099_s0, %s1099_s0, %s1100_s11  }
 0x182 PF: > { %s500_s29 = sand.u32 1, %s1027_s12   ;;  %p1511_p6 = scmp.ge.s32.totalorder %s1039_s15, 2 }
 0x183   : > { %s501_s7 = scalar_lea.sflag [#allocation4], %s500_s29 }
 0x184   : > { %p691_p13 = pnand %p1511_p6, %p1177_p12 }
 0x186   : > { %p692_p0 = pneg %p691_p13 }
 0x188   : > { %1022 = dma.done.wait (%p692_p0), %s501_s7, 96  }
 0x189   : > { %1024 = vsyncadd (%p692_p0), %s501_s7, 4294967200  ;;  %p18_p7 = scmp.ge.s32.totalorder %s1146_s18, 4   ;;  %s1512_s12 = smov %s1031_s13 }
 0x18a   : > { %s1513_s13 = smov %s1035_s14  ;;  %s1514_s14 = smov %s1158_s21 }
 0x18b   : > { %s1515_s15 = smov %s1146_s18  ;;  %20 = sbr.rel (!%p18_p7) target bundleno = 10 (0xa), region = 132 }
 0x190   :  { %507 = vsyncpa [#allocation3], 1 }
 0x191   :  { %509 = vsyncpa [#allocation3 + $0x1], 1 }
 0x192   :  { %510 = vsyncpa [#allocation4], 1 }
 0x193   :  { %512 = vsyncpa [#allocation4 + $0x1], 1 }
 0x194   :  { %513 = vsyncpa [#allocation5], 1 }
 0x195   :  { %515 = vsyncpa [#allocation5 + $0x1], 1 }
 0x196   :  { %516 = vsyncpa [#allocation7], 1 }

</bundles_post_ra>
